<compile_context>
chip_gen: v5e
topology: v5e:2x2
jax: 0.10.0
libtpu: 0.0.40
codegen_flags: <defaults>
</compile_context>

<pallas_src>
import functools

import jax
import jax.numpy as jnp
from jax.experimental import pallas as pl
from jax.experimental.pallas import tpu as pltpu


def _gru_recurrent_kernel(gi_ref, whh_ref, bi_ref, bh_ref, h_ref, *,
                          hid, total_t, t_blk, unroll):
    """Runs up to t_blk GRU steps per grid iteration; h_ref is the resident carry.

    gi_ref : (t_blk, B_blk, 3H) bf16 -- precomputed input projections x @ W_ih^T,
                                        gate order (r, z, n) along the last dim.
    whh_ref: (H, 3H)            bf16 -- lane-concatenated W_hh^T (one fused matmul/step).
    bi_ref : (1, 3H)            f32  -- b_ih.
    bh_ref : (1, 3H)            f32  -- b_hh (the n-gate part must stay inside r*(...)).
    h_ref  : (B_blk, H)         f32  -- hidden-state carry / final output block.
    """
    tb = pl.program_id(1)
    n_tb = pl.num_programs(1)

    @pl.when(tb == 0)
    def _():
        h_ref[...] = jnp.zeros_like(h_ref)

    # Loaded once per grid iteration; resident across the inner time loop.
    whh = whh_ref[...]
    b_i = bi_ref[...]
    b_h = bh_ref[...]

    def step(i, h):
        gi = gi_ref[i].astype(jnp.float32) + b_i                      # (B_blk, 3H)
        gh = jnp.dot(h.astype(jnp.bfloat16), whh,                     # single fused
                     preferred_element_type=jnp.float32) + b_h        # (B_blk, 3H)
        r = jax.nn.sigmoid(gi[:, :hid] + gh[:, :hid])                 # f32 gate math
        z = jax.nn.sigmoid(gi[:, hid:2 * hid] + gh[:, hid:2 * hid])
        n = jnp.tanh(gi[:, 2 * hid:] + r * gh[:, 2 * hid:])
        return (1.0 - z) * n + z * h

    rem = total_t % t_blk                    # static: only the last block is ragged
    if rem == 0:
        h_ref[...] = jax.lax.fori_loop(0, t_blk, step, h_ref[...], unroll=unroll)
    else:
        @pl.when(tb != n_tb - 1)             # full blocks: select-free, full trip count
        def _():
            h_ref[...] = jax.lax.fori_loop(0, t_blk, step, h_ref[...], unroll=unroll)

        @pl.when(tb == n_tb - 1)             # ragged tail: static remainder trip count,
        def _():                             # padded/clamped GI steps are never executed
            rem_unroll = True if rem <= 64 else 16
            h_ref[...] = jax.lax.fori_loop(0, rem, step, h_ref[...],
                                           unroll=rem_unroll)


def prepare_session_encoder_params(w_ih, w_hh, b_ih, b_hh):
    """One-time preprocessing of PyTorch-layout GRU params (do at init, not per call).

    w_ih: (3H, I), w_hh: (3H, H), b_ih/b_hh: (3H,), gate order (r, z, n).
    """
    H = w_hh.shape[1]
    w_ih_t = jnp.transpose(w_ih).astype(jnp.bfloat16)     # (I, 3H) bf16 MXU operand
    whh_t = jnp.transpose(w_hh).astype(jnp.bfloat16)      # (H, 3H) lane-concat W_hh^T
    b_i = b_ih.reshape(1, 3 * H).astype(jnp.float32)
    b_h = b_hh.reshape(1, 3 * H).astype(jnp.float32)
    return {"w_ih_t": w_ih_t, "whh_t": whh_t, "b_i": b_i, "b_h": b_h}


def _pick_batch_block(B):
    # Split batch only when it is large enough to fill MXU rows per block; at
    # small B a single block avoids pointless grid overhead.
    for cand in (256, 128):
        if B > cand and B % cand == 0:
            return cand
    return B


def _pick_time_block(T, b_blk, three_h):
    # Double-buffered bf16 GI block: 2 * t_blk * b_blk * 3H * 2 bytes <= ~12 MiB
    # (fits v7x's 64 MiB physical VMEM and v5e's raised scoped limit with margin).
    budget_bytes = 12 * 1024 * 1024
    per_step_bytes = b_blk * three_h * 2
    t_blk = max(1, budget_bytes // (2 * per_step_bytes))
    return int(min(t_blk, T, 256))           # 256 steps >> 0.35us grid-step overhead


@jax.jit
def session_encoder_forward(x, params):
    """x: (B, T, I) float32, batch_first (like the PyTorch module).

    Returns h_n of shape (B, 1, H), matching SessionEncoder.forward.
    """
    B, T, I = x.shape
    H = params["whh_t"].shape[0]
    three_h = 3 * H

    # ---- Parallel phase: hoisted input projection, emitted directly time-major. ----
    x_tm = jnp.transpose(x, (1, 0, 2)).astype(jnp.bfloat16)            # (T, B, I)
    gi = jax.lax.dot_general(x_tm, params["w_ih_t"],
                             dimension_numbers=(((2,), (0,)), ((), ())),
                             preferred_element_type=jnp.float32)       # (T, B, 3H)
    gi = gi.astype(jnp.bfloat16)             # streamed tensor in bf16 (HBM + VMEM /2)

    # ---- Serial phase: time-blocked recurrence, batch-parallel across cores. ----
    b_blk = _pick_batch_block(B)
    t_blk = _pick_time_block(T, b_blk, three_h)
    n_b = B // b_blk
    n_t = pl.cdiv(T, t_blk)
    unroll = True if t_blk <= 64 else 16

    kernel = functools.partial(_gru_recurrent_kernel,
                               hid=H, total_t=T, t_blk=t_blk, unroll=unroll)

    h_n = pl.pallas_call(
        kernel,
        out_shape=jax.ShapeDtypeStruct((B, H), jnp.float32),
        grid=(n_b, n_t),
        in_specs=[
            pl.BlockSpec((t_blk, b_blk, three_h),
                         lambda bb, tb: (tb, bb, 0)),      # streamed lane-dense GI
            pl.BlockSpec((H, three_h), lambda bb, tb: (0, 0)),   # resident W_hh^T
            pl.BlockSpec((1, three_h), lambda bb, tb: (0, 0)),   # resident b_ih
            pl.BlockSpec((1, three_h), lambda bb, tb: (0, 0)),   # resident b_hh
        ],
        out_specs=pl.BlockSpec((b_blk, H), lambda bb, tb: (bb, 0)),  # resident h carry
        compiler_params=pltpu.CompilerParams(
            dimension_semantics=("parallel", "arbitrary"),   # batch || , time = carry
            vmem_limit_bytes=32 * 1024 * 1024),               # raises v5e's 16 MiB default
    )(gi, params["whh_t"], params["b_i"], params["b_h"])

    return h_n.reshape(B, 1, H)   # h_n.view(x.size(0), -1, hid_size)


def _reference_gru_matched(x, w_ih, w_hh, b_ih, b_hh):
    """lax.scan reference with the kernel's numerics (bf16 operands + bf16 GI, f32 acc)."""
    B, T, I = x.shape
    H = w_hh.shape[1]
    h0 = jnp.zeros((B, H), jnp.float32)
    w_ih_t = w_ih.T.astype(jnp.bfloat16)
    w_hh_t = w_hh.T.astype(jnp.bfloat16)

    x_tm = jnp.transpose(x, (1, 0, 2)).astype(jnp.bfloat16)            # (T, B, I)
    gi_all = jax.lax.dot_general(x_tm, w_ih_t,
                                 dimension_numbers=(((2,), (0,)), ((), ())),
                                 preferred_element_type=jnp.float32)
    gi_all = gi_all.astype(jnp.bfloat16)                               # (T, B, 3H)

    def step(h, gi_t):
        gi = gi_t.astype(jnp.float32) + b_ih
        gh = jnp.dot(h.astype(jnp.bfloat16), w_hh_t,
                     preferred_element_type=jnp.float32) + b_hh
        r = jax.nn.sigmoid(gi[:, :H] + gh[:, :H])
        z = jax.nn.sigmoid(gi[:, H:2 * H] + gh[:, H:2 * H])
        n = jnp.tanh(gi[:, 2 * H:] + r * gh[:, 2 * H:])
        return (1.0 - z) * n + z * h, None

    h_final, _ = jax.lax.scan(step, h0, gi_all)
    return h_final.reshape(B, 1, H)


def _reference_gru_f32(x, w_ih, w_hh, b_ih, b_hh):
    """Full-f32 lax.scan reference (the PyTorch module's math)."""
    B, T, I = x.shape
    H = w_hh.shape[1]
    h0 = jnp.zeros((B, H), jnp.float32)
    hi = jax.lax.Precision.HIGHEST

    def step(h, x_t):
        gi = jnp.dot(x_t, w_ih.T, precision=hi) + b_ih
        gh = jnp.dot(h, w_hh.T, precision=hi) + b_hh
        i_r, i_z, i_n = gi[:, :H], gi[:, H:2 * H], gi[:, 2 * H:]
        h_r, h_z, h_n = gh[:, :H], gh[:, H:2 * H], gh[:, 2 * H:]
        r = jax.nn.sigmoid(i_r + h_r)
        z = jax.nn.sigmoid(i_z + h_z)
        n = jnp.tanh(i_n + r * h_n)
        return (1.0 - z) * n + z * h, None

    h_final, _ = jax.lax.scan(step, h0, jnp.transpose(x, (1, 0, 2)))
    return h_final.reshape(B, 1, H)


if __name__ == "__main__":
    B, T, I, H = 2, 8, 32, 32   # batch, seq_len, inp_size (ut_hid), hid_size (ses_hid)

    key = jax.random.PRNGKey(0)
    kx, k1, k2, k3, k4 = jax.random.split(key, 5)

    x = jax.random.normal(kx, (B, T, I), dtype=jnp.float32)

    # Deterministic nn.GRU-style U(-1/sqrt(H), 1/sqrt(H)) parameter init.
    bound = 1.0 / (H ** 0.5)
    w_ih = jax.random.uniform(k1, (3 * H, I), jnp.float32, -bound, bound)
    w_hh = jax.random.uniform(k2, (3 * H, H), jnp.float32, -bound, bound)
    b_ih = jax.random.uniform(k3, (3 * H,), jnp.float32, -bound, bound)
    b_hh = jax.random.uniform(k4, (3 * H,), jnp.float32, -bound, bound)

    # TODO(synk): nn.GRU dropout=options.drp is a no-op for num_layers=1; omitted.
    # TODO(synk): the remaining Seq2Seq pieces (embedding lookup, packed-sequence
    # length handling, Decoder token loop) are outside this kernel's scope, which
    # covers SessionEncoder.forward.

    params = prepare_session_encoder_params(w_ih, w_hh, b_ih, b_hh)
    out = session_encoder_forward(x, params)
    jax.block_until_ready(out)

    ref_matched = _reference_gru_matched(x, w_ih, w_hh, b_ih, b_hh)
    ref_f32 = _reference_gru_f32(x, w_ih, w_hh, b_ih, b_hh)

    assert out.shape == (B, 1, H)
    # Matches a reference with identical numerics (bf16 MXU operands, bf16 GI, f32 acc).
    assert jnp.allclose(out, ref_matched, atol=5e-3, rtol=0.0), (
        float(jnp.max(jnp.abs(out - ref_matched))))
    # Stays within the expected bf16-operand band of the full-f32 GRU.
    assert jnp.allclose(out, ref_f32, atol=5e-2, rtol=0.0), (
        float(jnp.max(jnp.abs(out - ref_f32))))

    print("KERNEL_OK")
</pallas_src>

<mosaic_0001>
module attributes {stable_mosaic.version = 11 : i64} {
  func.func @_gru_recurrent_kernel(%arg0: i32, %arg1: i32, %arg2: memref<8x2x96xbf16, #tpu.memory_space<vmem>>, %arg3: memref<32x96xbf16, #tpu.memory_space<vmem>>, %arg4: memref<1x96xf32, #tpu.memory_space<vmem>>, %arg5: memref<1x96xf32, #tpu.memory_space<vmem>>, %arg6: memref<2x32xf32, #tpu.memory_space<vmem>>) attributes {dimension_semantics = [#tpu.dimension_semantics<parallel>, #tpu.dimension_semantics<arbitrary>], iteration_bounds = array<i64: 1, 1>, scalar_prefetch = 0 : i64, scratch_operands = 0 : i64, tpu.core_type = #tpu.core_type<tc>, window_params = [{transform_indices = @transform_0, window_bounds = array<i64: 8, 2, 96>}, {pipeline_mode = #tpu.pipeline_mode<synchronous>, transform_indices = @transform_1, window_bounds = array<i64: 32, 96>}, {pipeline_mode = #tpu.pipeline_mode<synchronous>, transform_indices = @transform_2, window_bounds = array<i64: 1, 96>}, {pipeline_mode = #tpu.pipeline_mode<synchronous>, transform_indices = @transform_3, window_bounds = array<i64: 1, 96>}, {transform_indices = @transform_4, window_bounds = array<i64: 2, 32>}]} {
    %c0_i32 = arith.constant 0 : i32
    %0 = arith.cmpi eq, %arg1, %c0_i32 : i32
    %1 = arith.extui %0 : i1 to i32
    %c0_i32_0 = arith.constant 0 : i32
    %2 = arith.cmpi ne, %1, %c0_i32_0 : i32
    scf.if %2 {
      %cst_58 = arith.constant 0.000000e+00 : f32
      %296 = vector.broadcast %cst_58 : f32 to vector<2x32xf32>
      %c0_59 = arith.constant 0 : index
      %c0_60 = arith.constant 0 : index
      %297 = vector.load %arg6[%c0_59, %c0_60] : memref<2x32xf32, #tpu.memory_space<vmem>>, vector<2x32xf32>
      tpu.vector_store %arg6[%c0_59, %c0_60], %296 {strides = array<i32>} : memref<2x32xf32, #tpu.memory_space<vmem>>, vector<2x32xf32>,
    } else {
    }
    %c0 = arith.constant 0 : index
    %c0_1 = arith.constant 0 : index
    %3 = vector.load %arg3[%c0, %c0_1] : memref<32x96xbf16, #tpu.memory_space<vmem>>, vector<32x96xbf16>
    %c0_2 = arith.constant 0 : index
    %c0_3 = arith.constant 0 : index
    %4 = vector.load %arg4[%c0_2, %c0_3] : memref<1x96xf32, #tpu.memory_space<vmem>>, vector<1x96xf32>
    %c0_4 = arith.constant 0 : index
    %c0_5 = arith.constant 0 : index
    %5 = vector.load %arg5[%c0_4, %c0_5] : memref<1x96xf32, #tpu.memory_space<vmem>>, vector<1x96xf32>
    %c0_6 = arith.constant 0 : index
    %c0_7 = arith.constant 0 : index
    %6 = vector.load %arg6[%c0_6, %c0_7] : memref<2x32xf32, #tpu.memory_space<vmem>>, vector<2x32xf32>
    %c0_i32_8 = arith.constant 0 : i32
    %7 = arith.index_cast %c0_i32_8 : i32 to index
    %c0_9 = arith.constant 0 : index
    %c0_10 = arith.constant 0 : index
    %8 = vector.load %arg2[%7, %c0_9, %c0_10] : memref<8x2x96xbf16, #tpu.memory_space<vmem>>, vector<1x2x96xbf16>
    %9 = vector.shape_cast %8 : vector<1x2x96xbf16> to vector<2x96xbf16>
    %10 = arith.extf %9 : vector<2x96xbf16> to vector<2x96xf32>
    %11 = vector.broadcast %4 : vector<1x96xf32> to vector<2x96xf32>
    %12 = arith.addf %10, %11 : vector<2x96xf32>
    %13 = arith.truncf %6 : vector<2x32xf32> to vector<2x32xbf16>
    %cst = arith.constant dense<0.000000e+00> : vector<2x96xf32>
    %14 = tpu.matmul %13, %3, %cst {dimension_numbers = #tpu.dot_dimension_numbers<[1], [0], [0], [1], [0, 0, 1, 1], [], []>} : vector<2x32xbf16>, vector<32x96xbf16>, vector<2x96xf32> -> vector<2x96xf32>
    %15 = vector.broadcast %5 : vector<1x96xf32> to vector<2x96xf32>
    %16 = arith.addf %14, %15 : vector<2x96xf32>
    %17 = vector.extract_strided_slice %12 {offsets = [0, 0], sizes = [2, 32], strides = [1, 1]} : vector<2x96xf32> to vector<2x32xf32>
    %18 = vector.extract_strided_slice %16 {offsets = [0, 0], sizes = [2, 32], strides = [1, 1]} : vector<2x96xf32> to vector<2x32xf32>
    %19 = arith.addf %17, %18 : vector<2x32xf32>
    %20 = arith.negf %19 : vector<2x32xf32>
    %21 = math.exp %20 : vector<2x32xf32>
    %cst_11 = arith.constant 1.000000e+00 : f32
    %22 = vector.broadcast %cst_11 : f32 to vector<2x32xf32>
    %23 = arith.addf %22, %21 : vector<2x32xf32>
    %24 = arith.divf %22, %23 : vector<2x32xf32>
    %25 = vector.extract_strided_slice %12 {offsets = [0, 32], sizes = [2, 32], strides = [1, 1]} : vector<2x96xf32> to vector<2x32xf32>
    %26 = vector.extract_strided_slice %16 {offsets = [0, 32], sizes = [2, 32], strides = [1, 1]} : vector<2x96xf32> to vector<2x32xf32>
    %27 = arith.addf %25, %26 : vector<2x32xf32>
    %28 = arith.negf %27 : vector<2x32xf32>
    %29 = math.exp %28 : vector<2x32xf32>
    %cst_12 = arith.constant 1.000000e+00 : f32
    %30 = vector.broadcast %cst_12 : f32 to vector<2x32xf32>
    %31 = arith.addf %30, %29 : vector<2x32xf32>
    %32 = arith.divf %30, %31 : vector<2x32xf32>
    %33 = vector.extract_strided_slice %12 {offsets = [0, 64], sizes = [2, 32], strides = [1, 1]} : vector<2x96xf32> to vector<2x32xf32>
    %34 = vector.extract_strided_slice %16 {offsets = [0, 64], sizes = [2, 32], strides = [1, 1]} : vector<2x96xf32> to vector<2x32xf32>
    %35 = arith.mulf %24, %34 : vector<2x32xf32>
    %36 = arith.addf %33, %35 : vector<2x32xf32>
    %37 = math.tanh %36 : vector<2x32xf32>
    %cst_13 = arith.constant 1.000000e+00 : f32
    %38 = vector.broadcast %cst_13 : f32 to vector<2x32xf32>
    %39 = arith.subf %38, %32 : vector<2x32xf32>
    %40 = arith.mulf %39, %37 : vector<2x32xf32>
    %41 = arith.mulf %32, %6 : vector<2x32xf32>
    %42 = arith.addf %40, %41 : vector<2x32xf32>
    %c1_i32 = arith.constant 1 : i32
    %43 = arith.index_cast %c1_i32 : i32 to index
    %c0_14 = arith.constant 0 : index
    %c0_15 = arith.constant 0 : index
    %44 = vector.load %arg2[%43, %c0_14, %c0_15] : memref<8x2x96xbf16, #tpu.memory_space<vmem>>, vector<1x2x96xbf16>
    %45 = vector.shape_cast %44 : vector<1x2x96xbf16> to vector<2x96xbf16>
    %46 = arith.extf %45 : vector<2x96xbf16> to vector<2x96xf32>
    %47 = vector.broadcast %4 : vector<1x96xf32> to vector<2x96xf32>
    %48 = arith.addf %46, %47 : vector<2x96xf32>
    %49 = arith.truncf %42 : vector<2x32xf32> to vector<2x32xbf16>
    %cst_16 = arith.constant dense<0.000000e+00> : vector<2x96xf32>
    %50 = tpu.matmul %49, %3, %cst_16 {dimension_numbers = #tpu.dot_dimension_numbers<[1], [0], [0], [1], [0, 0, 1, 1], [], []>} : vector<2x32xbf16>, vector<32x96xbf16>, vector<2x96xf32> -> vector<2x96xf32>
    %51 = vector.broadcast %5 : vector<1x96xf32> to vector<2x96xf32>
    %52 = arith.addf %50, %51 : vector<2x96xf32>
    %53 = vector.extract_strided_slice %48 {offsets = [0, 0], sizes = [2, 32], strides = [1, 1]} : vector<2x96xf32> to vector<2x32xf32>
    %54 = vector.extract_strided_slice %52 {offsets = [0, 0], sizes = [2, 32], strides = [1, 1]} : vector<2x96xf32> to vector<2x32xf32>
    %55 = arith.addf %53, %54 : vector<2x32xf32>
    %56 = arith.negf %55 : vector<2x32xf32>
    %57 = math.exp %56 : vector<2x32xf32>
    %cst_17 = arith.constant 1.000000e+00 : f32
    %58 = vector.broadcast %cst_17 : f32 to vector<2x32xf32>
    %59 = arith.addf %58, %57 : vector<2x32xf32>
    %60 = arith.divf %58, %59 : vector<2x32xf32>
    %61 = vector.extract_strided_slice %48 {offsets = [0, 32], sizes = [2, 32], strides = [1, 1]} : vector<2x96xf32> to vector<2x32xf32>
    %62 = vector.extract_strided_slice %52 {offsets = [0, 32], sizes = [2, 32], strides = [1, 1]} : vector<2x96xf32> to vector<2x32xf32>
    %63 = arith.addf %61, %62 : vector<2x32xf32>
    %64 = arith.negf %63 : vector<2x32xf32>
    %65 = math.exp %64 : vector<2x32xf32>
    %cst_18 = arith.constant 1.000000e+00 : f32
    %66 = vector.broadcast %cst_18 : f32 to vector<2x32xf32>
    %67 = arith.addf %66, %65 : vector<2x32xf32>
    %68 = arith.divf %66, %67 : vector<2x32xf32>
    %69 = vector.extract_strided_slice %48 {offsets = [0, 64], sizes = [2, 32], strides = [1, 1]} : vector<2x96xf32> to vector<2x32xf32>
    %70 = vector.extract_strided_slice %52 {offsets = [0, 64], sizes = [2, 32], strides = [1, 1]} : vector<2x96xf32> to vector<2x32xf32>
    %71 = arith.mulf %60, %70 : vector<2x32xf32>
    %72 = arith.addf %69, %71 : vector<2x32xf32>
    %73 = math.tanh %72 : vector<2x32xf32>
    %cst_19 = arith.constant 1.000000e+00 : f32
    %74 = vector.broadcast %cst_19 : f32 to vector<2x32xf32>
    %75 = arith.subf %74, %68 : vector<2x32xf32>
    %76 = arith.mulf %75, %73 : vector<2x32xf32>
    %77 = arith.mulf %68, %42 : vector<2x32xf32>
    %78 = arith.addf %76, %77 : vector<2x32xf32>
    %c2_i32 = arith.constant 2 : i32
    %79 = arith.index_cast %c2_i32 : i32 to index
    %c0_20 = arith.constant 0 : index
    %c0_21 = arith.constant 0 : index
    %80 = vector.load %arg2[%79, %c0_20, %c0_21] : memref<8x2x96xbf16, #tpu.memory_space<vmem>>, vector<1x2x96xbf16>
    %81 = vector.shape_cast %80 : vector<1x2x96xbf16> to vector<2x96xbf16>
    %82 = arith.extf %81 : vector<2x96xbf16> to vector<2x96xf32>
    %83 = vector.broadcast %4 : vector<1x96xf32> to vector<2x96xf32>
    %84 = arith.addf %82, %83 : vector<2x96xf32>
    %85 = arith.truncf %78 : vector<2x32xf32> to vector<2x32xbf16>
    %cst_22 = arith.constant dense<0.000000e+00> : vector<2x96xf32>
    %86 = tpu.matmul %85, %3, %cst_22 {dimension_numbers = #tpu.dot_dimension_numbers<[1], [0], [0], [1], [0, 0, 1, 1], [], []>} : vector<2x32xbf16>, vector<32x96xbf16>, vector<2x96xf32> -> vector<2x96xf32>
    %87 = vector.broadcast %5 : vector<1x96xf32> to vector<2x96xf32>
    %88 = arith.addf %86, %87 : vector<2x96xf32>
    %89 = vector.extract_strided_slice %84 {offsets = [0, 0], sizes = [2, 32], strides = [1, 1]} : vector<2x96xf32> to vector<2x32xf32>
    %90 = vector.extract_strided_slice %88 {offsets = [0, 0], sizes = [2, 32], strides = [1, 1]} : vector<2x96xf32> to vector<2x32xf32>
    %91 = arith.addf %89, %90 : vector<2x32xf32>
    %92 = arith.negf %91 : vector<2x32xf32>
    %93 = math.exp %92 : vector<2x32xf32>
    %cst_23 = arith.constant 1.000000e+00 : f32
    %94 = vector.broadcast %cst_23 : f32 to vector<2x32xf32>
    %95 = arith.addf %94, %93 : vector<2x32xf32>
    %96 = arith.divf %94, %95 : vector<2x32xf32>
    %97 = vector.extract_strided_slice %84 {offsets = [0, 32], sizes = [2, 32], strides = [1, 1]} : vector<2x96xf32> to vector<2x32xf32>
    %98 = vector.extract_strided_slice %88 {offsets = [0, 32], sizes = [2, 32], strides = [1, 1]} : vector<2x96xf32> to vector<2x32xf32>
    %99 = arith.addf %97, %98 : vector<2x32xf32>
    %100 = arith.negf %99 : vector<2x32xf32>
    %101 = math.exp %100 : vector<2x32xf32>
    %cst_24 = arith.constant 1.000000e+00 : f32
    %102 = vector.broadcast %cst_24 : f32 to vector<2x32xf32>
    %103 = arith.addf %102, %101 : vector<2x32xf32>
    %104 = arith.divf %102, %103 : vector<2x32xf32>
    %105 = vector.extract_strided_slice %84 {offsets = [0, 64], sizes = [2, 32], strides = [1, 1]} : vector<2x96xf32> to vector<2x32xf32>
    %106 = vector.extract_strided_slice %88 {offsets = [0, 64], sizes = [2, 32], strides = [1, 1]} : vector<2x96xf32> to vector<2x32xf32>
    %107 = arith.mulf %96, %106 : vector<2x32xf32>
    %108 = arith.addf %105, %107 : vector<2x32xf32>
    %109 = math.tanh %108 : vector<2x32xf32>
    %cst_25 = arith.constant 1.000000e+00 : f32
    %110 = vector.broadcast %cst_25 : f32 to vector<2x32xf32>
    %111 = arith.subf %110, %104 : vector<2x32xf32>
    %112 = arith.mulf %111, %109 : vector<2x32xf32>
    %113 = arith.mulf %104, %78 : vector<2x32xf32>
    %114 = arith.addf %112, %113 : vector<2x32xf32>
    %c3_i32 = arith.constant 3 : i32
    %115 = arith.index_cast %c3_i32 : i32 to index
    %c0_26 = arith.constant 0 : index
    %c0_27 = arith.constant 0 : index
    %116 = vector.load %arg2[%115, %c0_26, %c0_27] : memref<8x2x96xbf16, #tpu.memory_space<vmem>>, vector<1x2x96xbf16>
    %117 = vector.shape_cast %116 : vector<1x2x96xbf16> to vector<2x96xbf16>
    %118 = arith.extf %117 : vector<2x96xbf16> to vector<2x96xf32>
    %119 = vector.broadcast %4 : vector<1x96xf32> to vector<2x96xf32>
    %120 = arith.addf %118, %119 : vector<2x96xf32>
    %121 = arith.truncf %114 : vector<2x32xf32> to vector<2x32xbf16>
    %cst_28 = arith.constant dense<0.000000e+00> : vector<2x96xf32>
    %122 = tpu.matmul %121, %3, %cst_28 {dimension_numbers = #tpu.dot_dimension_numbers<[1], [0], [0], [1], [0, 0, 1, 1], [], []>} : vector<2x32xbf16>, vector<32x96xbf16>, vector<2x96xf32> -> vector<2x96xf32>
    %123 = vector.broadcast %5 : vector<1x96xf32> to vector<2x96xf32>
    %124 = arith.addf %122, %123 : vector<2x96xf32>
    %125 = vector.extract_strided_slice %120 {offsets = [0, 0], sizes = [2, 32], strides = [1, 1]} : vector<2x96xf32> to vector<2x32xf32>
    %126 = vector.extract_strided_slice %124 {offsets = [0, 0], sizes = [2, 32], strides = [1, 1]} : vector<2x96xf32> to vector<2x32xf32>
    %127 = arith.addf %125, %126 : vector<2x32xf32>
    %128 = arith.negf %127 : vector<2x32xf32>
    %129 = math.exp %128 : vector<2x32xf32>
    %cst_29 = arith.constant 1.000000e+00 : f32
    %130 = vector.broadcast %cst_29 : f32 to vector<2x32xf32>
    %131 = arith.addf %130, %129 : vector<2x32xf32>
    %132 = arith.divf %130, %131 : vector<2x32xf32>
    %133 = vector.extract_strided_slice %120 {offsets = [0, 32], sizes = [2, 32], strides = [1, 1]} : vector<2x96xf32> to vector<2x32xf32>
    %134 = vector.extract_strided_slice %124 {offsets = [0, 32], sizes = [2, 32], strides = [1, 1]} : vector<2x96xf32> to vector<2x32xf32>
    %135 = arith.addf %133, %134 : vector<2x32xf32>
    %136 = arith.negf %135 : vector<2x32xf32>
    %137 = math.exp %136 : vector<2x32xf32>
    %cst_30 = arith.constant 1.000000e+00 : f32
    %138 = vector.broadcast %cst_30 : f32 to vector<2x32xf32>
    %139 = arith.addf %138, %137 : vector<2x32xf32>
    %140 = arith.divf %138, %139 : vector<2x32xf32>
    %141 = vector.extract_strided_slice %120 {offsets = [0, 64], sizes = [2, 32], strides = [1, 1]} : vector<2x96xf32> to vector<2x32xf32>
    %142 = vector.extract_strided_slice %124 {offsets = [0, 64], sizes = [2, 32], strides = [1, 1]} : vector<2x96xf32> to vector<2x32xf32>
    %143 = arith.mulf %132, %142 : vector<2x32xf32>
    %144 = arith.addf %141, %143 : vector<2x32xf32>
    %145 = math.tanh %144 : vector<2x32xf32>
    %cst_31 = arith.constant 1.000000e+00 : f32
    %146 = vector.broadcast %cst_31 : f32 to vector<2x32xf32>
    %147 = arith.subf %146, %140 : vector<2x32xf32>
    %148 = arith.mulf %147, %145 : vector<2x32xf32>
    %149 = arith.mulf %140, %114 : vector<2x32xf32>
    %150 = arith.addf %148, %149 : vector<2x32xf32>
    %c4_i32 = arith.constant 4 : i32
    %151 = arith.index_cast %c4_i32 : i32 to index
    %c0_32 = arith.constant 0 : index
    %c0_33 = arith.constant 0 : index
    %152 = vector.load %arg2[%151, %c0_32, %c0_33] : memref<8x2x96xbf16, #tpu.memory_space<vmem>>, vector<1x2x96xbf16>
    %153 = vector.shape_cast %152 : vector<1x2x96xbf16> to vector<2x96xbf16>
    %154 = arith.extf %153 : vector<2x96xbf16> to vector<2x96xf32>
    %155 = vector.broadcast %4 : vector<1x96xf32> to vector<2x96xf32>
    %156 = arith.addf %154, %155 : vector<2x96xf32>
    %157 = arith.truncf %150 : vector<2x32xf32> to vector<2x32xbf16>
    %cst_34 = arith.constant dense<0.000000e+00> : vector<2x96xf32>
    %158 = tpu.matmul %157, %3, %cst_34 {dimension_numbers = #tpu.dot_dimension_numbers<[1], [0], [0], [1], [0, 0, 1, 1], [], []>} : vector<2x32xbf16>, vector<32x96xbf16>, vector<2x96xf32> -> vector<2x96xf32>
    %159 = vector.broadcast %5 : vector<1x96xf32> to vector<2x96xf32>
    %160 = arith.addf %158, %159 : vector<2x96xf32>
    %161 = vector.extract_strided_slice %156 {offsets = [0, 0], sizes = [2, 32], strides = [1, 1]} : vector<2x96xf32> to vector<2x32xf32>
    %162 = vector.extract_strided_slice %160 {offsets = [0, 0], sizes = [2, 32], strides = [1, 1]} : vector<2x96xf32> to vector<2x32xf32>
    %163 = arith.addf %161, %162 : vector<2x32xf32>
    %164 = arith.negf %163 : vector<2x32xf32>
    %165 = math.exp %164 : vector<2x32xf32>
    %cst_35 = arith.constant 1.000000e+00 : f32
    %166 = vector.broadcast %cst_35 : f32 to vector<2x32xf32>
    %167 = arith.addf %166, %165 : vector<2x32xf32>
    %168 = arith.divf %166, %167 : vector<2x32xf32>
    %169 = vector.extract_strided_slice %156 {offsets = [0, 32], sizes = [2, 32], strides = [1, 1]} : vector<2x96xf32> to vector<2x32xf32>
    %170 = vector.extract_strided_slice %160 {offsets = [0, 32], sizes = [2, 32], strides = [1, 1]} : vector<2x96xf32> to vector<2x32xf32>
    %171 = arith.addf %169, %170 : vector<2x32xf32>
    %172 = arith.negf %171 : vector<2x32xf32>
    %173 = math.exp %172 : vector<2x32xf32>
    %cst_36 = arith.constant 1.000000e+00 : f32
    %174 = vector.broadcast %cst_36 : f32 to vector<2x32xf32>
    %175 = arith.addf %174, %173 : vector<2x32xf32>
    %176 = arith.divf %174, %175 : vector<2x32xf32>
    %177 = vector.extract_strided_slice %156 {offsets = [0, 64], sizes = [2, 32], strides = [1, 1]} : vector<2x96xf32> to vector<2x32xf32>
    %178 = vector.extract_strided_slice %160 {offsets = [0, 64], sizes = [2, 32], strides = [1, 1]} : vector<2x96xf32> to vector<2x32xf32>
    %179 = arith.mulf %168, %178 : vector<2x32xf32>
    %180 = arith.addf %177, %179 : vector<2x32xf32>
    %181 = math.tanh %180 : vector<2x32xf32>
    %cst_37 = arith.constant 1.000000e+00 : f32
    %182 = vector.broadcast %cst_37 : f32 to vector<2x32xf32>
    %183 = arith.subf %182, %176 : vector<2x32xf32>
    %184 = arith.mulf %183, %181 : vector<2x32xf32>
    %185 = arith.mulf %176, %150 : vector<2x32xf32>
    %186 = arith.addf %184, %185 : vector<2x32xf32>
    %c5_i32 = arith.constant 5 : i32
    %187 = arith.index_cast %c5_i32 : i32 to index
    %c0_38 = arith.constant 0 : index
    %c0_39 = arith.constant 0 : index
    %188 = vector.load %arg2[%187, %c0_38, %c0_39] : memref<8x2x96xbf16, #tpu.memory_space<vmem>>, vector<1x2x96xbf16>
    %189 = vector.shape_cast %188 : vector<1x2x96xbf16> to vector<2x96xbf16>
    %190 = arith.extf %189 : vector<2x96xbf16> to vector<2x96xf32>
    %191 = vector.broadcast %4 : vector<1x96xf32> to vector<2x96xf32>
    %192 = arith.addf %190, %191 : vector<2x96xf32>
    %193 = arith.truncf %186 : vector<2x32xf32> to vector<2x32xbf16>
    %cst_40 = arith.constant dense<0.000000e+00> : vector<2x96xf32>
    %194 = tpu.matmul %193, %3, %cst_40 {dimension_numbers = #tpu.dot_dimension_numbers<[1], [0], [0], [1], [0, 0, 1, 1], [], []>} : vector<2x32xbf16>, vector<32x96xbf16>, vector<2x96xf32> -> vector<2x96xf32>
    %195 = vector.broadcast %5 : vector<1x96xf32> to vector<2x96xf32>
    %196 = arith.addf %194, %195 : vector<2x96xf32>
    %197 = vector.extract_strided_slice %192 {offsets = [0, 0], sizes = [2, 32], strides = [1, 1]} : vector<2x96xf32> to vector<2x32xf32>
    %198 = vector.extract_strided_slice %196 {offsets = [0, 0], sizes = [2, 32], strides = [1, 1]} : vector<2x96xf32> to vector<2x32xf32>
    %199 = arith.addf %197, %198 : vector<2x32xf32>
    %200 = arith.negf %199 : vector<2x32xf32>
    %201 = math.exp %200 : vector<2x32xf32>
    %cst_41 = arith.constant 1.000000e+00 : f32
    %202 = vector.broadcast %cst_41 : f32 to vector<2x32xf32>
    %203 = arith.addf %202, %201 : vector<2x32xf32>
    %204 = arith.divf %202, %203 : vector<2x32xf32>
    %205 = vector.extract_strided_slice %192 {offsets = [0, 32], sizes = [2, 32], strides = [1, 1]} : vector<2x96xf32> to vector<2x32xf32>
    %206 = vector.extract_strided_slice %196 {offsets = [0, 32], sizes = [2, 32], strides = [1, 1]} : vector<2x96xf32> to vector<2x32xf32>
    %207 = arith.addf %205, %206 : vector<2x32xf32>
    %208 = arith.negf %207 : vector<2x32xf32>
    %209 = math.exp %208 : vector<2x32xf32>
    %cst_42 = arith.constant 1.000000e+00 : f32
    %210 = vector.broadcast %cst_42 : f32 to vector<2x32xf32>
    %211 = arith.addf %210, %209 : vector<2x32xf32>
    %212 = arith.divf %210, %211 : vector<2x32xf32>
    %213 = vector.extract_strided_slice %192 {offsets = [0, 64], sizes = [2, 32], strides = [1, 1]} : vector<2x96xf32> to vector<2x32xf32>
    %214 = vector.extract_strided_slice %196 {offsets = [0, 64], sizes = [2, 32], strides = [1, 1]} : vector<2x96xf32> to vector<2x32xf32>
    %215 = arith.mulf %204, %214 : vector<2x32xf32>
    %216 = arith.addf %213, %215 : vector<2x32xf32>
    %217 = math.tanh %216 : vector<2x32xf32>
    %cst_43 = arith.constant 1.000000e+00 : f32
    %218 = vector.broadcast %cst_43 : f32 to vector<2x32xf32>
    %219 = arith.subf %218, %212 : vector<2x32xf32>
    %220 = arith.mulf %219, %217 : vector<2x32xf32>
    %221 = arith.mulf %212, %186 : vector<2x32xf32>
    %222 = arith.addf %220, %221 : vector<2x32xf32>
    %c6_i32 = arith.constant 6 : i32
    %223 = arith.index_cast %c6_i32 : i32 to index
    %c0_44 = arith.constant 0 : index
    %c0_45 = arith.constant 0 : index
    %224 = vector.load %arg2[%223, %c0_44, %c0_45] : memref<8x2x96xbf16, #tpu.memory_space<vmem>>, vector<1x2x96xbf16>
    %225 = vector.shape_cast %224 : vector<1x2x96xbf16> to vector<2x96xbf16>
    %226 = arith.extf %225 : vector<2x96xbf16> to vector<2x96xf32>
    %227 = vector.broadcast %4 : vector<1x96xf32> to vector<2x96xf32>
    %228 = arith.addf %226, %227 : vector<2x96xf32>
    %229 = arith.truncf %222 : vector<2x32xf32> to vector<2x32xbf16>
    %cst_46 = arith.constant dense<0.000000e+00> : vector<2x96xf32>
    %230 = tpu.matmul %229, %3, %cst_46 {dimension_numbers = #tpu.dot_dimension_numbers<[1], [0], [0], [1], [0, 0, 1, 1], [], []>} : vector<2x32xbf16>, vector<32x96xbf16>, vector<2x96xf32> -> vector<2x96xf32>
    %231 = vector.broadcast %5 : vector<1x96xf32> to vector<2x96xf32>
    %232 = arith.addf %230, %231 : vector<2x96xf32>
    %233 = vector.extract_strided_slice %228 {offsets = [0, 0], sizes = [2, 32], strides = [1, 1]} : vector<2x96xf32> to vector<2x32xf32>
    %234 = vector.extract_strided_slice %232 {offsets = [0, 0], sizes = [2, 32], strides = [1, 1]} : vector<2x96xf32> to vector<2x32xf32>
    %235 = arith.addf %233, %234 : vector<2x32xf32>
    %236 = arith.negf %235 : vector<2x32xf32>
    %237 = math.exp %236 : vector<2x32xf32>
    %cst_47 = arith.constant 1.000000e+00 : f32
    %238 = vector.broadcast %cst_47 : f32 to vector<2x32xf32>
    %239 = arith.addf %238, %237 : vector<2x32xf32>
    %240 = arith.divf %238, %239 : vector<2x32xf32>
    %241 = vector.extract_strided_slice %228 {offsets = [0, 32], sizes = [2, 32], strides = [1, 1]} : vector<2x96xf32> to vector<2x32xf32>
    %242 = vector.extract_strided_slice %232 {offsets = [0, 32], sizes = [2, 32], strides = [1, 1]} : vector<2x96xf32> to vector<2x32xf32>
    %243 = arith.addf %241, %242 : vector<2x32xf32>
    %244 = arith.negf %243 : vector<2x32xf32>
    %245 = math.exp %244 : vector<2x32xf32>
    %cst_48 = arith.constant 1.000000e+00 : f32
    %246 = vector.broadcast %cst_48 : f32 to vector<2x32xf32>
    %247 = arith.addf %246, %245 : vector<2x32xf32>
    %248 = arith.divf %246, %247 : vector<2x32xf32>
    %249 = vector.extract_strided_slice %228 {offsets = [0, 64], sizes = [2, 32], strides = [1, 1]} : vector<2x96xf32> to vector<2x32xf32>
    %250 = vector.extract_strided_slice %232 {offsets = [0, 64], sizes = [2, 32], strides = [1, 1]} : vector<2x96xf32> to vector<2x32xf32>
    %251 = arith.mulf %240, %250 : vector<2x32xf32>
    %252 = arith.addf %249, %251 : vector<2x32xf32>
    %253 = math.tanh %252 : vector<2x32xf32>
    %cst_49 = arith.constant 1.000000e+00 : f32
    %254 = vector.broadcast %cst_49 : f32 to vector<2x32xf32>
    %255 = arith.subf %254, %248 : vector<2x32xf32>
    %256 = arith.mulf %255, %253 : vector<2x32xf32>
    %257 = arith.mulf %248, %222 : vector<2x32xf32>
    %258 = arith.addf %256, %257 : vector<2x32xf32>
    %c7_i32 = arith.constant 7 : i32
    %259 = arith.index_cast %c7_i32 : i32 to index
    %c0_50 = arith.constant 0 : index
    %c0_51 = arith.constant 0 : index
    %260 = vector.load %arg2[%259, %c0_50, %c0_51] : memref<8x2x96xbf16, #tpu.memory_space<vmem>>, vector<1x2x96xbf16>
    %261 = vector.shape_cast %260 : vector<1x2x96xbf16> to vector<2x96xbf16>
    %262 = arith.extf %261 : vector<2x96xbf16> to vector<2x96xf32>
    %263 = vector.broadcast %4 : vector<1x96xf32> to vector<2x96xf32>
    %264 = arith.addf %262, %263 : vector<2x96xf32>
    %265 = arith.truncf %258 : vector<2x32xf32> to vector<2x32xbf16>
    %cst_52 = arith.constant dense<0.000000e+00> : vector<2x96xf32>
    %266 = tpu.matmul %265, %3, %cst_52 {dimension_numbers = #tpu.dot_dimension_numbers<[1], [0], [0], [1], [0, 0, 1, 1], [], []>} : vector<2x32xbf16>, vector<32x96xbf16>, vector<2x96xf32> -> vector<2x96xf32>
    %267 = vector.broadcast %5 : vector<1x96xf32> to vector<2x96xf32>
    %268 = arith.addf %266, %267 : vector<2x96xf32>
    %269 = vector.extract_strided_slice %264 {offsets = [0, 0], sizes = [2, 32], strides = [1, 1]} : vector<2x96xf32> to vector<2x32xf32>
    %270 = vector.extract_strided_slice %268 {offsets = [0, 0], sizes = [2, 32], strides = [1, 1]} : vector<2x96xf32> to vector<2x32xf32>
    %271 = arith.addf %269, %270 : vector<2x32xf32>
    %272 = arith.negf %271 : vector<2x32xf32>
    %273 = math.exp %272 : vector<2x32xf32>
    %cst_53 = arith.constant 1.000000e+00 : f32
    %274 = vector.broadcast %cst_53 : f32 to vector<2x32xf32>
    %275 = arith.addf %274, %273 : vector<2x32xf32>
    %276 = arith.divf %274, %275 : vector<2x32xf32>
    %277 = vector.extract_strided_slice %264 {offsets = [0, 32], sizes = [2, 32], strides = [1, 1]} : vector<2x96xf32> to vector<2x32xf32>
    %278 = vector.extract_strided_slice %268 {offsets = [0, 32], sizes = [2, 32], strides = [1, 1]} : vector<2x96xf32> to vector<2x32xf32>
    %279 = arith.addf %277, %278 : vector<2x32xf32>
    %280 = arith.negf %279 : vector<2x32xf32>
    %281 = math.exp %280 : vector<2x32xf32>
    %cst_54 = arith.constant 1.000000e+00 : f32
    %282 = vector.broadcast %cst_54 : f32 to vector<2x32xf32>
    %283 = arith.addf %282, %281 : vector<2x32xf32>
    %284 = arith.divf %282, %283 : vector<2x32xf32>
    %285 = vector.extract_strided_slice %264 {offsets = [0, 64], sizes = [2, 32], strides = [1, 1]} : vector<2x96xf32> to vector<2x32xf32>
    %286 = vector.extract_strided_slice %268 {offsets = [0, 64], sizes = [2, 32], strides = [1, 1]} : vector<2x96xf32> to vector<2x32xf32>
    %287 = arith.mulf %276, %286 : vector<2x32xf32>
    %288 = arith.addf %285, %287 : vector<2x32xf32>
    %289 = math.tanh %288 : vector<2x32xf32>
    %cst_55 = arith.constant 1.000000e+00 : f32
    %290 = vector.broadcast %cst_55 : f32 to vector<2x32xf32>
    %291 = arith.subf %290, %284 : vector<2x32xf32>
    %292 = arith.mulf %291, %289 : vector<2x32xf32>
    %293 = arith.mulf %284, %258 : vector<2x32xf32>
    %294 = arith.addf %292, %293 : vector<2x32xf32>
    %c8_i32 = arith.constant 8 : i32
    %c0_56 = arith.constant 0 : index
    %c0_57 = arith.constant 0 : index
    %295 = vector.load %arg6[%c0_56, %c0_57] : memref<2x32xf32, #tpu.memory_space<vmem>>, vector<2x32xf32>
    tpu.vector_store %arg6[%c0_56, %c0_57], %294 {strides = array<i32>} : memref<2x32xf32, #tpu.memory_space<vmem>>, vector<2x32xf32>,
    return
  }
  func.func @transform_0(%arg0: i32, %arg1: i32) -> (i32, i32, i32) {
    %c0_i32 = arith.constant 0 : i32
    %c0_i32_0 = arith.constant 0 : i32
    return %arg1, %arg0, %c0_i32 : i32, i32, i32
  }
  func.func @transform_1(%arg0: i32, %arg1: i32) -> (i32, i32) {
    %c0_i32 = arith.constant 0 : i32
    %c0_i32_0 = arith.constant 0 : i32
    %c0_i32_1 = arith.constant 0 : i32
    return %c0_i32, %c0_i32_0 : i32, i32
  }
  func.func @transform_2(%arg0: i32, %arg1: i32) -> (i32, i32) {
    %c0_i32 = arith.constant 0 : i32
    %c0_i32_0 = arith.constant 0 : i32
    %c0_i32_1 = arith.constant 0 : i32
    return %c0_i32, %c0_i32_0 : i32, i32
  }
  func.func @transform_3(%arg0: i32, %arg1: i32) -> (i32, i32) {
    %c0_i32 = arith.constant 0 : i32
    %c0_i32_0 = arith.constant 0 : i32
    %c0_i32_1 = arith.constant 0 : i32
    return %c0_i32, %c0_i32_0 : i32, i32
  }
  func.func @transform_4(%arg0: i32, %arg1: i32) -> (i32, i32) {
    %c0_i32 = arith.constant 0 : i32
    %c0_i32_0 = arith.constant 0 : i32
    return %arg0, %c0_i32 : i32, i32
  }
}

</mosaic_0001>

<bundles_post_ra>
// kernel: session_encoder_forward.1
= control target key start
LH: loop header
LB: loop body
LE: loop exit
PB: predicated region body
PF: predicated region fallthrough
CT: control target
= control target key end

     0   :  { %vm23_vm0 = vcmask 254976   ;;  %v693_v1 = vmov 0.0   ;;  %s824_s0 = inlined_call_operand.vmem [shape: bf16[8,2,96], index: 0, kind: input, shape index: {}]   ;;  %s825_s1 = inlined_call_operand.vmem [shape: bf16[32,96], index: 1, kind: input, shape index: {}]   ;;  %s826_s2 = inlined_call_operand.vmem [shape: f32[1,96], index: 2, kind: input, shape index: {}]   ;;  %s827_s3 = inlined_call_operand.vmem [shape: f32[1,96], index: 3, kind: input, shape index: {}]   ;;  %s828_s4 = inlined_call_operand.hbm [shape: f32[2,32], index: 4, kind: output, shape index: {}]  }
   0x1   :  { %v611_v0 = vld [vmem:[%s825_s1 + $0x8] sm:$0xff]  ;;  %24 = vst.msk [vmem:[#allocation2] sm:$0x3] %vm23_vm0, %v693_v1  ;;  %v610_v2 = vld [vmem:[%s825_s1] sm:$0xff] }
   0x2   :  { %64 = vmatpush.bf16.msra.mxu0 %v611_v0  ;;  %131 = vmatpush.bf16.msra.mxu1 %v611_v0 }
   0x3   :  { %194 = vmatpush.bf16.msra.mxu2 %v611_v0  ;;  %257 = vmatpush.bf16.msra.mxu3 %v611_v0 }
   0x4   :  { %9 = vsyncpa [#allocation3], 0  ;;  %vm54_vm1 = vcmask 261120   ;;  %v734_v5 = vld [vmem:[%s827_s3] ss:$0 sm:$0xff]  ;;  %s694_s20 = smov 64  }
   0x5   :  { %v32_v9 = vld [vmem:[%s824_s0] sm:$0x1]  ;;  %s696_s3 = smov 32   ;;  %v589_v43 = vld [vmem:[%s824_s0 + $0x1] sm:$0x1]  ;;  %s570_s16 = sshll.u32 %s828_s4, 4  ;;  %s571_s16 = int_to_ptr.hbm [resolvable:$true] %s570_s16 }
   0x6   :  { %65 = vmatpush.bf16.msra.mxu0 %v610_v2  ;;  %132 = vmatpush.bf16.msra.mxu1 %v610_v2  ;;  %v33_v10 = vunpack.c.l.bf16 %v32_v9  ;;  %v744_v11 = vld [vmem:[%s826_s2] ss:$0 sm:$0xff]  ;;  %s695_s2 = smov 96   ;;  %v116_v44 = vunpack.c.l.bf16 %v589_v43 }
   0x7   :  { %195 = vmatpush.bf16.msra.mxu2 %v610_v2  ;;  %258 = vmatpush.bf16.msra.mxu3 %v610_v2 }
   0x8   :  { %v31_v3 = vld [vmem:[#allocation2] sm:$0x3]  ;;  %v37_v12 = vadd.f32 %v744_v11, %v33_v10  ;;  %v117_v45 = vadd.f32 %v744_v11, %v116_v44 }
   0x9   :  { %v38_v4 = vpack.c.bf16 %v31_v3, %v31_v3 }
   0xa   :  { %320 = vmatpush.bf16.msrb.mxu0 %v611_v0  ;;  %383 = vmatpush.bf16.msrb.mxu1 %v611_v0 }
   0xb   :  { %446 = vmatpush.bf16.msrb.mxu2 %v611_v0  ;;  %509 = vmatpush.bf16.msrb.mxu3 %v611_v0 }
   0xc   :  { %587 = vmatmul.msk.bf16.vlgmr.msra.gmra.mxu0 %vm54_vm1, %v38_v4 }
   0xe   :  { %321 = vmatpush.bf16.msrb.mxu0 %v610_v2  ;;  %384 = vmatpush.bf16.msrb.mxu1 %v610_v2 }
   0xf   :  { %447 = vmatpush.bf16.msrb.mxu2 %v610_v2  ;;  %510 = vmatpush.bf16.msrb.mxu3 %v610_v2 }
  0x89   :  { %v67_v6 = vpop.f32.mrf.mxu0 }
  0x8a   :  { %v68_v7 = vadd.f32 %v734_v5, %v67_v6 }
  0x8c   :  { %92 = vrot.lane.b32.xlu0 %v68_v7, %s694_s20  ;;  %v71_v13 = vadd.f32 %v68_v7, %v37_v12 }
  0x8e   :  { %v588_v14 = vmul.f32 -1.442695, %v71_v13  ;;  %v592_v13 = vld [vmem:[%s824_s0 + $0x2] sm:$0x1] }
  0x90   :  { %619 = vpow2.f32 %v588_v14  ;;  %v179_v14 = vunpack.c.l.bf16 %v592_v13 }
  0x91   :  { %v69_v8 = vpop.f32.mrf.mxu0 }
  0x96   :  { %v620_v15 = vpop.eup %619 }
  0x97   :  { %v75_v16 = vadd.f32 1.0, %v620_v15  ;;  %v180_v15 = vadd.f32 %v744_v11, %v179_v14 }
  0x99   :  { %621 = vrcp.f32 %v75_v16  ;;  %v87_v22 = vand.u32 2147483648, %v75_v16  ;;  %vm81_vm3 = vweird.f32 %v75_v16  ;;  %v85_v23 = vand.u32 2147483647, %v75_v16 }
  0x9b   :  { %v88_v25 = vor.u32 1.1754944e-38, %v87_v22  ;;  %vm86_vm5 = vcmp.eq.f32.partialorder %v85_v23, 8.507059e+37 }
  0x9f   :  { %v622_v17 = vpop.eup %621 }
  0xa0   :  { %v77_v18 = vmul.f32 %v622_v17, %v75_v16  ;;  %vm82_vm2 = vweird.f32 %v622_v17 }
  0xa1   :  { %vm83_vm4 = vmor %vm81_vm3, %vm82_vm2 }
  0xa2   :  { %v78_v19 = vsub.f32 1.0, %v77_v18 }
  0xa4   :  { %v79_v20 = vmul.f32 %v622_v17, %v78_v19 }
  0xa6   :  { %v80_v21 = vadd.f32 %v622_v17, %v79_v20 }
  0xa8   :  { %v84_v24 = vsel %vm83_vm4, %v622_v17, %v80_v21 }
  0xa9   :  { %v89_v27 = vsel %vm86_vm5, %v88_v25, %v84_v24 }
  0xaa   :  { %v102_v33 = vsub.f32 1.0, %v89_v27 }
  0xfe   :  { %v93_v26 = vpop.permute.xlu0 %92 }
  0xff   :  { %v95_v28 = vmul.f32 %v93_v26, %v89_v27 }
 0x101   :  { %97 = vrot.lane.b32.xlu0 %v95_v28, %s694_s20 }
 0x173   :  { %v98_v29 = vpop.permute.xlu0 %97 }
 0x174   :  { %v100_v30 = vadd.f32 %v98_v29, %v37_v12 }
 0x176   :  { %623 = vtanh.f32 %v100_v30 }
 0x17c   :  { %v624_v31 = vpop.eup %623 }
 0x17d   :  { %104 = vrot.lane.b32.xlu1 %v624_v31, %s695_s2 }
 0x185   :  { %109 = vrot.lane.b32.xlu1 %v31_v3, %s696_s3 }
 0x1ef   :  { %v105_v32 = vpop.permute.xlu1 %104 }
 0x1f0   :  { %v107_v35 = vmul.f32 %v105_v32, %v102_v33 }
 0x1f7   :  { %v110_v34 = vpop.permute.xlu1 %109 }
 0x1f8   :  { %v112_v36 = vmul.f32 %v110_v34, %v89_v27 }
 0x1fa   :  { %v113_v37 = vadd.f32 %v112_v36, %v107_v35 }
 0x1fc   :  { %v118_v38 = vpack.c.bf16 %v113_v37, %v113_v37 }
 0x1fe   :  { %120 = vrot.lane.b32.xlu2 %v118_v38, %s695_s2 }
 0x258   :  { %v121_v39 = vpop.permute.xlu2 %120 }
 0x259   :  { %590 = vmatmul.msk.bf16.vlgmr.msra.gmra.mxu1 %vm54_vm1, %v121_v39 }
 0x2d6   :  { %v134_v40 = vpop.f32.mrf.mxu1 }
 0x2d7   :  { %v135_v41 = vadd.f32 %v734_v5, %v134_v40 }
 0x2d9   :  { %159 = vrot.lane.b32.xlu2 %v135_v41, %s694_s20  ;;  %v138_v46 = vadd.f32 %v135_v41, %v117_v45 }
 0x2db   :  { %v591_v47 = vmul.f32 -1.442695, %v138_v46 }
 0x2dd   :  { %625 = vpow2.f32 %v591_v47 }
 0x2de   :  { %v136_v42 = vpop.f32.mrf.mxu1 }
 0x2e3   :  { %v626_v48 = vpop.eup %625 }
 0x2e4   :  { %v142_v49 = vadd.f32 1.0, %v626_v48 }
 0x2e6   :  { %627 = vrcp.f32 %v142_v49  ;;  %v154_v55 = vand.u32 2147483648, %v142_v49  ;;  %vm148_vm7 = vweird.f32 %v142_v49  ;;  %v152_v56 = vand.u32 2147483647, %v142_v49 }
 0x2e8   :  { %v155_v58 = vor.u32 1.1754944e-38, %v154_v55  ;;  %vm153_vm9 = vcmp.eq.f32.partialorder %v152_v56, 8.507059e+37 }
 0x2ec   :  { %v628_v50 = vpop.eup %627 }
 0x2ed   :  { %v144_v51 = vmul.f32 %v628_v50, %v142_v49  ;;  %vm149_vm6 = vweird.f32 %v628_v50 }
 0x2ee   :  { %vm150_vm8 = vmor %vm148_vm7, %vm149_vm6 }
 0x2ef   :  { %v145_v52 = vsub.f32 1.0, %v144_v51 }
 0x2f1   :  { %v146_v53 = vmul.f32 %v628_v50, %v145_v52 }
 0x2f3   :  { %v147_v54 = vadd.f32 %v628_v50, %v146_v53 }
 0x2f5   :  { %v151_v57 = vsel %vm150_vm8, %v628_v50, %v147_v54 }
 0x2f6   :  { %v156_v60 = vsel %vm153_vm9, %v155_v58, %v151_v57 }
 0x2f7   :  { %v169_v1 = vsub.f32 1.0, %v156_v60  ;;  %v175_v3 = vmul.f32 %v156_v60, %v113_v37 }
 0x333   :  { %v160_v59 = vpop.permute.xlu2 %159 }
 0x334   :  { %v162_v61 = vmul.f32 %v160_v59, %v156_v60 }
 0x336   :  { %164 = vrot.lane.b32.xlu0 %v162_v61, %s694_s20 }
 0x3a8   :  { %v165_v62 = vpop.permute.xlu0 %164 }
 0x3a9   :  { %v167_v63 = vadd.f32 %v165_v62, %v117_v45  ;;  %v595_v45 = vld [vmem:[%s824_s0 + $0x3] sm:$0x1] }
 0x3aa   :  { %v242_v46 = vunpack.c.l.bf16 %v595_v45 }
 0x3ab   :  { %629 = vtanh.f32 %v167_v63 }
 0x3ac   :  { %v243_v47 = vadd.f32 %v744_v11, %v242_v46 }
 0x3b1   :  { %v630_v0 = vpop.eup %629 }
 0x3b2   :  { %171 = vrot.lane.b32.xlu1 %v630_v0, %s695_s2 }
 0x424   :  { %v172_v2 = vpop.permute.xlu1 %171 }
 0x425   :  { %v174_v4 = vmul.f32 %v172_v2, %v169_v1 }
 0x427   :  { %v176_v6 = vadd.f32 %v175_v3, %v174_v4 }
 0x429   :  { %v181_v7 = vpack.c.bf16 %v176_v6, %v176_v6 }
 0x42b   :  { %183 = vrot.lane.b32.xlu2 %v181_v7, %s695_s2 }
 0x485   :  { %v184_v8 = vpop.permute.xlu2 %183 }
 0x486   :  { %593 = vmatmul.msk.bf16.vlgmr.msra.gmra.mxu2 %vm54_vm1, %v184_v8 }
 0x509   :  { %v197_v9 = vpop.f32.mrf.mxu2 }
 0x50a   :  { %v198_v10 = vadd.f32 %v734_v5, %v197_v9 }
 0x50c   :  { %222 = vrot.lane.b32.xlu0 %v198_v10, %s694_s20  ;;  %v201_v16 = vadd.f32 %v198_v10, %v180_v15 }
 0x50e   :  { %v594_v17 = vmul.f32 -1.442695, %v201_v16 }
 0x510   :  { %631 = vpow2.f32 %v594_v17 }
 0x511   :  { %v199_v12 = vpop.f32.mrf.mxu2 }
 0x516   :  { %v632_v18 = vpop.eup %631 }
 0x517   :  { %v205_v19 = vadd.f32 1.0, %v632_v18 }
 0x519   :  { %633 = vrcp.f32 %v205_v19  ;;  %v217_v25 = vand.u32 2147483648, %v205_v19  ;;  %vm211_vm11 = vweird.f32 %v205_v19  ;;  %v215_v26 = vand.u32 2147483647, %v205_v19 }
 0x51b   :  { %v218_v28 = vor.u32 1.1754944e-38, %v217_v25  ;;  %vm216_vm13 = vcmp.eq.f32.partialorder %v215_v26, 8.507059e+37 }
 0x51f   :  { %v634_v20 = vpop.eup %633 }
 0x520   :  { %v207_v21 = vmul.f32 %v634_v20, %v205_v19  ;;  %vm212_vm10 = vweird.f32 %v634_v20 }
 0x521   :  { %vm213_vm12 = vmor %vm211_vm11, %vm212_vm10 }
 0x522   :  { %v208_v22 = vsub.f32 1.0, %v207_v21 }
 0x524   :  { %v209_v23 = vmul.f32 %v634_v20, %v208_v22 }
 0x526   :  { %v210_v24 = vadd.f32 %v634_v20, %v209_v23 }
 0x528   :  { %v214_v27 = vsel %vm213_vm12, %v634_v20, %v210_v24 }
 0x529   :  { %v219_v30 = vsel %vm216_vm13, %v218_v28, %v214_v27 }
 0x52a   :  { %v232_v35 = vsub.f32 1.0, %v219_v30  ;;  %v238_v37 = vmul.f32 %v219_v30, %v176_v6 }
 0x57e   :  { %v223_v29 = vpop.permute.xlu0 %222 }
 0x57f   :  { %v225_v31 = vmul.f32 %v223_v29, %v219_v30 }
 0x581   :  { %227 = vrot.lane.b32.xlu1 %v225_v31, %s694_s20 }
 0x5f3   :  { %v228_v32 = vpop.permute.xlu1 %227 }
 0x5f4   :  { %v230_v33 = vadd.f32 %v228_v32, %v180_v15  ;;  %v598_v15 = vld [vmem:[%s824_s0 + $0x4] sm:$0x1] }
 0x5f5   :  { %v305_v16 = vunpack.c.l.bf16 %v598_v15 }
 0x5f6   :  { %635 = vtanh.f32 %v230_v33 }
 0x5f7   :  { %v306_v17 = vadd.f32 %v744_v11, %v305_v16 }
 0x5fc   :  { %v636_v34 = vpop.eup %635 }
 0x5fd   :  { %234 = vrot.lane.b32.xlu2 %v636_v34, %s695_s2 }
 0x657   :  { %v235_v36 = vpop.permute.xlu2 %234 }
 0x658   :  { %v237_v38 = vmul.f32 %v235_v36, %v232_v35 }
 0x65a   :  { %v239_v39 = vadd.f32 %v238_v37, %v237_v38 }
 0x65c   :  { %v244_v40 = vpack.c.bf16 %v239_v39, %v239_v39 }
 0x65e   :  { %246 = vrot.lane.b32.xlu0 %v244_v40, %s695_s2 }
 0x6d0   :  { %v247_v41 = vpop.permute.xlu0 %246 }
 0x6d1   :  { %596 = vmatmul.msk.bf16.vlgmr.msra.gmra.mxu3 %vm54_vm1, %v247_v41 }
 0x754   :  { %v260_v42 = vpop.f32.mrf.mxu3 }
 0x755   :  { %v261_v43 = vadd.f32 %v734_v5, %v260_v42 }
 0x757   :  { %285 = vrot.lane.b32.xlu1 %v261_v43, %s694_s20  ;;  %v264_v48 = vadd.f32 %v261_v43, %v243_v47 }
 0x759   :  { %v597_v49 = vmul.f32 -1.442695, %v264_v48 }
 0x75b   :  { %637 = vpow2.f32 %v597_v49 }
 0x75c   :  { %v262_v44 = vpop.f32.mrf.mxu3 }
 0x761   :  { %v638_v50 = vpop.eup %637 }
 0x762   :  { %v268_v51 = vadd.f32 1.0, %v638_v50 }
 0x764   :  { %639 = vrcp.f32 %v268_v51  ;;  %v280_v57 = vand.u32 2147483648, %v268_v51  ;;  %vm274_vm15 = vweird.f32 %v268_v51  ;;  %v278_v58 = vand.u32 2147483647, %v268_v51 }
 0x766   :  { %v281_v60 = vor.u32 1.1754944e-38, %v280_v57  ;;  %vm279_vm3 = vcmp.eq.f32.partialorder %v278_v58, 8.507059e+37 }
 0x76a   :  { %v640_v52 = vpop.eup %639 }
 0x76b   :  { %v270_v53 = vmul.f32 %v640_v52, %v268_v51  ;;  %vm275_vm14 = vweird.f32 %v640_v52 }
 0x76c   :  { %vm276_vm2 = vmor %vm274_vm15, %vm275_vm14 }
 0x76d   :  { %v271_v54 = vsub.f32 1.0, %v270_v53 }
 0x76f   :  { %v272_v55 = vmul.f32 %v640_v52, %v271_v54 }
 0x771   :  { %v273_v56 = vadd.f32 %v640_v52, %v272_v55 }
 0x773   :  { %v277_v59 = vsel %vm276_vm2, %v640_v52, %v273_v56 }
 0x774   :  { %v282_v62 = vsel %vm279_vm3, %v281_v60, %v277_v59 }
 0x775   :  { %v295_v3 = vsub.f32 1.0, %v282_v62  ;;  %v301_v6 = vmul.f32 %v282_v62, %v239_v39 }
 0x7c9   :  { %v286_v61 = vpop.permute.xlu1 %285 }
 0x7ca   :  { %v288_v63 = vmul.f32 %v286_v61, %v282_v62 }
 0x7cc   :  { %290 = vrot.lane.b32.xlu2 %v288_v63, %s694_s20 }
 0x826   :  { %v291_v0 = vpop.permute.xlu2 %290 }
 0x827   :  { %v293_v1 = vadd.f32 %v291_v0, %v243_v47  ;;  %v601_v47 = vld [vmem:[%s824_s0 + $0x5] sm:$0x1] }
 0x828   :  { %v368_v48 = vunpack.c.l.bf16 %v601_v47 }
 0x829   :  { %641 = vtanh.f32 %v293_v1 }
 0x82a   :  { %v369_v49 = vadd.f32 %v744_v11, %v368_v48 }
 0x82f   :  { %v642_v2 = vpop.eup %641 }
 0x830   :  { %297 = vrot.lane.b32.xlu0 %v642_v2, %s695_s2 }
 0x8a2   :  { %v298_v4 = vpop.permute.xlu0 %297 }
 0x8a3   :  { %v300_v7 = vmul.f32 %v298_v4, %v295_v3 }
 0x8a5   :  { %v302_v8 = vadd.f32 %v301_v6, %v300_v7 }
 0x8a7   :  { %v307_v9 = vpack.c.bf16 %v302_v8, %v302_v8 }
 0x8a9   :  { %309 = vrot.lane.b32.xlu1 %v307_v9, %s695_s2 }
 0x91b   :  { %v310_v10 = vpop.permute.xlu1 %309 }
 0x91c   :  { %599 = vmatmul.msk.bf16.vlgmr.msrb.gmra.mxu0 %vm54_vm1, %v310_v10 }
 0x999   :  { %v323_v12 = vpop.f32.mrf.mxu0 }
 0x99a   :  { %v324_v13 = vadd.f32 %v734_v5, %v323_v12 }
 0x99c   :  { %348 = vrot.lane.b32.xlu2 %v324_v13, %s694_s20  ;;  %v327_v18 = vadd.f32 %v324_v13, %v306_v17 }
 0x99e   :  { %v600_v19 = vmul.f32 -1.442695, %v327_v18 }
 0x9a0   :  { %643 = vpow2.f32 %v600_v19 }
 0x9a1   :  { %v325_v14 = vpop.f32.mrf.mxu0 }
 0x9a6   :  { %v644_v20 = vpop.eup %643 }
 0x9a7   :  { %v331_v21 = vadd.f32 1.0, %v644_v20 }
 0x9a9   :  { %645 = vrcp.f32 %v331_v21  ;;  %v343_v27 = vand.u32 2147483648, %v331_v21  ;;  %vm337_vm5 = vweird.f32 %v331_v21  ;;  %v341_v28 = vand.u32 2147483647, %v331_v21 }
 0x9ab   :  { %v344_v30 = vor.u32 1.1754944e-38, %v343_v27  ;;  %vm342_vm7 = vcmp.eq.f32.partialorder %v341_v28, 8.507059e+37 }
 0x9af   :  { %v646_v22 = vpop.eup %645 }
 0x9b0   :  { %v333_v23 = vmul.f32 %v646_v22, %v331_v21  ;;  %vm338_vm4 = vweird.f32 %v646_v22 }
 0x9b1   :  { %vm339_vm6 = vmor %vm337_vm5, %vm338_vm4 }
 0x9b2   :  { %v334_v24 = vsub.f32 1.0, %v333_v23 }
 0x9b4   :  { %v335_v25 = vmul.f32 %v646_v22, %v334_v24 }
 0x9b6   :  { %v336_v26 = vadd.f32 %v646_v22, %v335_v25 }
 0x9b8   :  { %v340_v29 = vsel %vm339_vm6, %v646_v22, %v336_v26 }
 0x9b9   :  { %v345_v32 = vsel %vm342_vm7, %v344_v30, %v340_v29 }
 0x9ba   :  { %v358_v37 = vsub.f32 1.0, %v345_v32  ;;  %v364_v39 = vmul.f32 %v345_v32, %v302_v8 }
 0x9f6   :  { %v349_v31 = vpop.permute.xlu2 %348 }
 0x9f7   :  { %v351_v33 = vmul.f32 %v349_v31, %v345_v32 }
 0x9f9   :  { %353 = vrot.lane.b32.xlu0 %v351_v33, %s694_s20 }
 0xa6b   :  { %v354_v34 = vpop.permute.xlu0 %353 }
 0xa6c   :  { %v356_v35 = vadd.f32 %v354_v34, %v306_v17  ;;  %v604_v17 = vld [vmem:[%s824_s0 + $0x6] sm:$0x1] }
 0xa6d   :  { %v431_v18 = vunpack.c.l.bf16 %v604_v17 }
 0xa6e   :  { %647 = vtanh.f32 %v356_v35 }
 0xa6f   :  { %v432_v19 = vadd.f32 %v744_v11, %v431_v18 }
 0xa74   :  { %v648_v36 = vpop.eup %647 }
 0xa75   :  { %360 = vrot.lane.b32.xlu1 %v648_v36, %s695_s2 }
 0xae7   :  { %v361_v38 = vpop.permute.xlu1 %360 }
 0xae8   :  { %v363_v40 = vmul.f32 %v361_v38, %v358_v37 }
 0xaea   :  { %v365_v41 = vadd.f32 %v364_v39, %v363_v40 }
 0xaec   :  { %v370_v42 = vpack.c.bf16 %v365_v41, %v365_v41 }
 0xaee   :  { %372 = vrot.lane.b32.xlu2 %v370_v42, %s695_s2 }
 0xb48   :  { %v373_v43 = vpop.permute.xlu2 %372 }
 0xb49   :  { %602 = vmatmul.msk.bf16.vlgmr.msrb.gmra.mxu1 %vm54_vm1, %v373_v43 }
 0xbc6   :  { %v386_v44 = vpop.f32.mrf.mxu1 }
 0xbc7   :  { %v387_v45 = vadd.f32 %v734_v5, %v386_v44 }
 0xbc9   :  { %411 = vrot.lane.b32.xlu0 %v387_v45, %s694_s20  ;;  %v390_v50 = vadd.f32 %v387_v45, %v369_v49 }
 0xbcb   :  { %v603_v51 = vmul.f32 -1.442695, %v390_v50 }
 0xbcd   :  { %649 = vpow2.f32 %v603_v51 }
 0xbce   :  { %v388_v46 = vpop.f32.mrf.mxu1 }
 0xbd3   :  { %v650_v52 = vpop.eup %649 }
 0xbd4   :  { %v394_v53 = vadd.f32 1.0, %v650_v52 }
 0xbd6   :  { %651 = vrcp.f32 %v394_v53  ;;  %v406_v59 = vand.u32 2147483648, %v394_v53  ;;  %vm400_vm9 = vweird.f32 %v394_v53  ;;  %v404_v60 = vand.u32 2147483647, %v394_v53 }
 0xbd8   :  { %v407_v62 = vor.u32 1.1754944e-38, %v406_v59  ;;  %vm405_vm11 = vcmp.eq.f32.partialorder %v404_v60, 8.507059e+37 }
 0xbdc   :  { %v652_v54 = vpop.eup %651 }
 0xbdd   :  { %v396_v55 = vmul.f32 %v652_v54, %v394_v53  ;;  %vm401_vm8 = vweird.f32 %v652_v54 }
 0xbde   :  { %vm402_vm10 = vmor %vm400_vm9, %vm401_vm8 }
 0xbdf   :  { %v397_v56 = vsub.f32 1.0, %v396_v55 }
 0xbe1   :  { %v398_v57 = vmul.f32 %v652_v54, %v397_v56 }
 0xbe3   :  { %v399_v58 = vadd.f32 %v652_v54, %v398_v57 }
 0xbe5   :  { %v403_v61 = vsel %vm402_vm10, %v652_v54, %v399_v58 }
 0xbe6   :  { %v408_v0 = vsel %vm405_vm11, %v407_v62, %v403_v61 }
 0xbe7   :  { %v421_v6 = vsub.f32 1.0, %v408_v0  ;;  %v427_v8 = vmul.f32 %v408_v0, %v365_v41 }
 0xc3b   :  { %v412_v63 = vpop.permute.xlu0 %411 }
 0xc3c   :  { %v414_v1 = vmul.f32 %v412_v63, %v408_v0 }
 0xc3e   :  { %416 = vrot.lane.b32.xlu1 %v414_v1, %s694_s20 }
 0xcb0   :  { %v417_v2 = vpop.permute.xlu1 %416 }
 0xcb1   :  { %v419_v3 = vadd.f32 %v417_v2, %v369_v49  ;;  %v607_v49 = vld [vmem:[%s824_s0 + $0x7] sm:$0x1]  ;;  %s697_s0 = smov [#allocation2]  }
 0xcb2   :  { %v494_v50 = vunpack.c.l.bf16 %v607_v49  ;;  %s568_s13 = sshll.u32 %s697_s0, 4  ;;  %s569_s13 = int_to_ptr.vmem [resolvable:$true] %s568_s13 }
 0xcb3   :  { %653 = vtanh.f32 %v419_v3 }
 0xcb4   :  { %v495_v51 = vadd.f32 %v744_v11, %v494_v50 }
 0xcb9   :  { %v654_v4 = vpop.eup %653 }
 0xcba   :  { %423 = vrot.lane.b32.xlu2 %v654_v4, %s695_s2 }
 0xd14   :  { %v424_v7 = vpop.permute.xlu2 %423 }
 0xd15   :  { %v426_v9 = vmul.f32 %v424_v7, %v421_v6 }
 0xd17   :  { %v428_v10 = vadd.f32 %v427_v8, %v426_v9 }
 0xd19   :  { %v433_v12 = vpack.c.bf16 %v428_v10, %v428_v10 }
 0xd1b   :  { %435 = vrot.lane.b32.xlu0 %v433_v12, %s695_s2 }
 0xd8d   :  { %v436_v13 = vpop.permute.xlu0 %435 }
 0xd8e   :  { %605 = vmatmul.msk.bf16.vlgmr.msrb.gmra.mxu2 %vm54_vm1, %v436_v13 }
 0xe11   :  { %v449_v14 = vpop.f32.mrf.mxu2 }
 0xe12   :  { %v450_v15 = vadd.f32 %v734_v5, %v449_v14 }
 0xe14   :  { %474 = vrot.lane.b32.xlu1 %v450_v15, %s694_s20  ;;  %v453_v20 = vadd.f32 %v450_v15, %v432_v19 }
 0xe16   :  { %v606_v21 = vmul.f32 -1.442695, %v453_v20 }
 0xe18   :  { %655 = vpow2.f32 %v606_v21 }
 0xe19   :  { %v451_v16 = vpop.f32.mrf.mxu2 }
 0xe1e   :  { %v656_v22 = vpop.eup %655 }
 0xe1f   :  { %v457_v23 = vadd.f32 1.0, %v656_v22 }
 0xe21   :  { %657 = vrcp.f32 %v457_v23  ;;  %v469_v29 = vand.u32 2147483648, %v457_v23  ;;  %vm463_vm13 = vweird.f32 %v457_v23  ;;  %v467_v30 = vand.u32 2147483647, %v457_v23 }
 0xe23   :  { %v470_v32 = vor.u32 1.1754944e-38, %v469_v29  ;;  %vm468_vm15 = vcmp.eq.f32.partialorder %v467_v30, 8.507059e+37 }
 0xe27   :  { %v658_v24 = vpop.eup %657 }
 0xe28   :  { %v459_v25 = vmul.f32 %v658_v24, %v457_v23  ;;  %vm464_vm12 = vweird.f32 %v658_v24 }
 0xe29   :  { %vm465_vm14 = vmor %vm463_vm13, %vm464_vm12 }
 0xe2a   :  { %v460_v26 = vsub.f32 1.0, %v459_v25 }
 0xe2c   :  { %v461_v27 = vmul.f32 %v658_v24, %v460_v26 }
 0xe2e   :  { %v462_v28 = vadd.f32 %v658_v24, %v461_v27 }
 0xe30   :  { %v466_v31 = vsel %vm465_vm14, %v658_v24, %v462_v28 }
 0xe31   :  { %v471_v34 = vsel %vm468_vm15, %v470_v32, %v466_v31 }
 0xe32   :  { %v484_v39 = vsub.f32 1.0, %v471_v34  ;;  %v490_v41 = vmul.f32 %v471_v34, %v428_v10 }
 0xe86   :  { %v475_v33 = vpop.permute.xlu1 %474 }
 0xe87   :  { %v477_v35 = vmul.f32 %v475_v33, %v471_v34 }
 0xe89   :  { %479 = vrot.lane.b32.xlu2 %v477_v35, %s694_s20 }
 0xee3   :  { %v480_v36 = vpop.permute.xlu2 %479 }
 0xee4   :  { %v482_v37 = vadd.f32 %v480_v36, %v432_v19 }
 0xee6   :  { %659 = vtanh.f32 %v482_v37 }
 0xeec   :  { %v660_v38 = vpop.eup %659 }
 0xeed   :  { %486 = vrot.lane.b32.xlu0 %v660_v38, %s695_s2 }
 0xf5f   :  { %v487_v40 = vpop.permute.xlu0 %486 }
 0xf60   :  { %v489_v42 = vmul.f32 %v487_v40, %v484_v39 }
 0xf62   :  { %v491_v43 = vadd.f32 %v490_v41, %v489_v42 }
 0xf64   :  { %v496_v44 = vpack.c.bf16 %v491_v43, %v491_v43 }
 0xf66   :  { %498 = vrot.lane.b32.xlu1 %v496_v44, %s695_s2 }
 0xfd8   :  { %v499_v45 = vpop.permute.xlu1 %498 }
 0xfd9   :  { %608 = vmatmul.msk.bf16.vlgmr.msrb.gmra.mxu3 %vm54_vm1, %v499_v45 }
0x105c   :  { %v512_v46 = vpop.f32.mrf.mxu3 }
0x105d   :  { %v513_v47 = vadd.f32 %v734_v5, %v512_v46 }
0x105f   :  { %537 = vrot.lane.b32.xlu2 %v513_v47, %s694_s20  ;;  %v516_v52 = vadd.f32 %v513_v47, %v495_v51 }
0x1061   :  { %v609_v53 = vmul.f32 -1.442695, %v516_v52 }
0x1063   :  { %661 = vpow2.f32 %v609_v53 }
0x1064   :  { %v514_v48 = vpop.f32.mrf.mxu3 }
0x1069   :  { %v662_v54 = vpop.eup %661 }
0x106a   :  { %v520_v55 = vadd.f32 1.0, %v662_v54 }
0x106c   :  { %663 = vrcp.f32 %v520_v55  ;;  %v532_v60 = vand.u32 2147483648, %v520_v55  ;;  %vm526_vm2 = vweird.f32 %v520_v55  ;;  %v530_v61 = vand.u32 2147483647, %v520_v55 }
0x106e   :  { %v533_v63 = vor.u32 1.1754944e-38, %v532_v60  ;;  %vm531_vm4 = vcmp.eq.f32.partialorder %v530_v61, 8.507059e+37 }
0x1072   :  { %v664_v56 = vpop.eup %663 }
0x1073   :  { %v522_v57 = vmul.f32 %v664_v56, %v520_v55  ;;  %vm527_vm1 = vweird.f32 %v664_v56 }
0x1074   :  { %vm528_vm3 = vmor %vm526_vm2, %vm527_vm1 }
0x1075   :  { %v523_v58 = vsub.f32 1.0, %v522_v57 }
0x1077   :  { %v524_v5 = vmul.f32 %v664_v56, %v523_v58 }
0x1079   :  { %v525_v59 = vadd.f32 %v664_v56, %v524_v5 }
0x107b   :  { %v529_v62 = vsel %vm528_vm3, %v664_v56, %v525_v59 }
0x107c   :  { %v534_v0 = vsel %vm531_vm4, %v533_v63, %v529_v62 }
0x107d   :  { %v547_v6 = vsub.f32 1.0, %v534_v0  ;;  %v553_v8 = vmul.f32 %v534_v0, %v491_v43 }
0x10b9   :  { %v538_v11 = vpop.permute.xlu2 %537 }
0x10ba   :  { %v540_v1 = vmul.f32 %v538_v11, %v534_v0 }
0x10bc   :  { %542 = vrot.lane.b32.xlu0 %v540_v1, %s694_s20 }
0x112e   :  { %v543_v2 = vpop.permute.xlu0 %542 }
0x112f   :  { %v545_v3 = vadd.f32 %v543_v2, %v495_v51 }
0x1131   :  { %665 = vtanh.f32 %v545_v3 }
0x1137   :  { %v666_v4 = vpop.eup %665 }
0x1138   :  { %549 = vrot.lane.b32.xlu1 %v666_v4, %s695_s2 }
0x11aa   :  { %v550_v7 = vpop.permute.xlu1 %549 }
0x11ab   :  { %v552_v9 = vmul.f32 %v550_v7, %v547_v6 }
0x11ad   :  { %v554_v10 = vadd.f32 %v553_v8, %v552_v9 }
0x11af   :  { %556 = vst [vmem:[#allocation1] ss:$4 sm:$0xff] %v554_v10 }
0x11b6   :  { %v557_v12 = vld.sshfl [vmem:[#allocation1] sm:$0xff pattern:$0x73625140] }
0x11b7   :  { %558 = vrot.lane.b32.xlu2 %v557_v12, %s695_s2 }
0x1211   :  { %v559_v13 = vpop.permute.xlu2 %558 }
0x1212   :  { %562 = vst.msk [vmem:[#allocation2] sm:$0x3] %vm23_vm0, %v559_v13 }
0x1213   :  { %573 = dma.vmem_to_hbm [thread:$0]  %s569_s13, 32, %s571_s16, [#allocation3]  }
0x1214   :  { %691 = dma.done.wait [#allocation3], 32  }
0x1215   :  { %692 = vsyncadd [#allocation3], 4294967264 }
0x1216   :  { %578 = vsyncpa [#allocation3], 1 }

</bundles_post_ra>
